<compile_context>
chip_gen: v7x
topology: tpu7x:2x2x1
jax: 0.10.0
libtpu: 0.0.40
codegen_flags: <defaults>
</compile_context>

<pallas_src>
import functools
from types import SimpleNamespace

import jax
import jax.numpy as jnp
from jax import lax
from jax.experimental import pallas as pl
from jax.experimental.pallas import tpu as pltpu

NEG_SLOPE = 0.01       # F.leaky_relu default
NORM_EPS = 1e-12       # F.normalize default eps
CLUSTER_EPS = 1e-8


def _round_up(a, b):
    return ((a + b - 1) // b) * b


def _mosaic_params(est_bytes, semantics=None):
    # Explicit scoped-VMEM limit sized from the estimated resident set
    # (2x margin, floor 32 MiB, cap 128 MiB).
    limit = int(min(128 * 1024 * 1024, max(32 * 1024 * 1024, 2 * est_bytes)))
    if semantics is None:
        return pltpu.CompilerParams(vmem_limit_bytes=limit)
    return pltpu.CompilerParams(dimension_semantics=semantics,
                                vmem_limit_bytes=limit)


# ----------------------------- in-kernel helpers -----------------------------

def _leaky_relu(x):
    return jnp.where(x >= 0, x, NEG_SLOPE * x)


def _caps_normalize(h, c, ct):
    # == F.normalize(h.view(rows, K, d//K), p=2, dim=2).view(rows, d)
    # per-capsule sum-of-squares via skinny (d,K) indicator matmul; broadcast
    # back with (K,d); rsqrt runs on the EUP.
    sq = jnp.dot(h * h, c, preferred_element_type=jnp.float32)          # (rows, K)
    inv = lax.rsqrt(jnp.maximum(sq, NORM_EPS * NORM_EPS))
    return h * jnp.dot(inv, ct, preferred_element_type=jnp.float32)


# ------------------------------- Pallas kernels -------------------------------

def _blend_kernel(x_ref, wa_ref, a_ref, ws_ref, b_ref, o_ref):
    # alpha is pre-folded into wa/ws/b:  out = x@(a*W_AE) + A@((1-a)*W_SE) + b
    o_ref[...] = (jnp.dot(x_ref[...], wa_ref[...], preferred_element_type=jnp.float32)
                  + jnp.dot(a_ref[...], ws_ref[...], preferred_element_type=jnp.float32)
                  + b_ref[...])


def _pca_kernel(x_ref, w_ref, b_ref, o_ref):
    h = jnp.dot(x_ref[...], w_ref[...], preferred_element_type=jnp.float32) + b_ref[...]
    o_ref[...] = _leaky_relu(h)   # TODO(synk): dropout == identity (inference mode)


def _rout_layer_kernel(src_ref, trg_ref, mcnt_ref, h_ref, c_ref, ct_ref, o_ref,
                       ucur_sc, uacc_sc, zb, ub, sb,
                       *, te, tau, m_pad, unroll):
    """One NeibRoutLayer for two stacked graphs.

    grid = (2 graphs ["parallel"], n_iter, edge_tiles); edge indices in SMEM.
    o_ref doubles as the x_n store until the very last step for its graph.
    """
    g, it, et = pl.program_id(0), pl.program_id(1), pl.program_id(2)
    n_it, n_et = pl.num_programs(1), pl.num_programs(2)
    c, ct = c_ref[...], ct_ref[...]
    d = sb.shape[1]

    @pl.when((it == 0) & (et == 0))
    def _():
        xn = _caps_normalize(h_ref[...], c, ct)
        o_ref[...] = xn            # x_n lives in the resident output block
        ucur_sc[...] = xn

    @pl.when(et == 0)
    def _():
        uacc_sc[...] = o_ref[...]  # seeds the "+ x" term of the scatter sum

    ebase = g * m_pad + et * te
    nsteps = te // unroll

    # --- gather edge tile: z = x_n[src], u_t = u_cur[trg]; manually unrolled
    #     row copies with the SMEM index reads hoisted per unrolled chunk. ---
    def gather_body(jo, carry):
        bj = jo * unroll
        idx = [(src_ref[ebase + bj + u], trg_ref[ebase + bj + u])
               for u in range(unroll)]
        for u, (s, t) in enumerate(idx):
            j = bj + u
            zb[pl.ds(j, 1), :] = o_ref[pl.ds(s, 1), :]
            ub[pl.ds(j, 1), :] = ucur_sc[pl.ds(t, 1), :]
        return carry

    lax.fori_loop(0, nsteps, gather_body, 0)

    # --- per-edge capsule attention (vectorized over the edge tile) ---
    z = zb[...]
    p_caps = jnp.dot(z * ub[...], c, preferred_element_type=jnp.float32)   # (te, K)
    logits = p_caps * (1.0 / tau)
    ex = jnp.exp(logits - jnp.max(logits, axis=1, keepdims=True))
    p = ex * pl.reciprocal(jnp.sum(ex, axis=1, keepdims=True), approx=True)
    pd = jnp.dot(p, ct, preferred_element_type=jnp.float32)                # (te, d)
    eidx = lax.broadcasted_iota(jnp.int32, (te, 1), 0) + et * te
    valid = (eidx < mcnt_ref[g]).astype(jnp.float32)                       # mask padding
    sb[...] = z * pd * valid

    # --- scatter-add over trg.  Edges are pre-sorted by target, so runs of
    #     equal targets are accumulated in registers and flushed with a single
    #     read-modify-write per run (instead of one per edge). ---
    def scatter_body(jo, carry):
        prev_t, acc = carry
        bj = jo * unroll
        ts = [trg_ref[ebase + bj + u] for u in range(unroll)]
        for u in range(unroll):
            t = ts[u]
            row = sb[pl.ds(bj + u, 1), :]

            @pl.when(t != prev_t)
            def _(pt=prev_t, a=acc):
                uacc_sc[pl.ds(pt, 1), :] += a

            acc = jnp.where(t == prev_t, acc + row, row)
            prev_t = t
        return prev_t, acc

    t0 = trg_ref[ebase]
    last_t, last_acc = lax.fori_loop(
        0, nsteps, scatter_body, (t0, jnp.zeros((1, d), jnp.float32)))
    uacc_sc[pl.ds(last_t, 1), :] += last_acc

    @pl.when(et == n_et - 1)
    def _():
        ucur_sc[...] = _caps_normalize(uacc_sc[...], c, ct)

    @pl.when((et == n_et - 1) & (it == n_it - 1))
    def _():
        o_ref[...] = _leaky_relu(ucur_sc[...])   # TODO(synk): dropout == identity


def _head_norm_kernel(hs_ref, c_ref, ct_ref, o1_ref, o2_ref, avg_ref, *, act):
    c, ct = c_ref[...], ct_ref[...]

    def post(h):
        if act == 'sigmoid':
            h = 1.0 / (1.0 + jnp.exp(-h))
        return _caps_normalize(h, c, ct)

    h1 = post(hs_ref[0])
    h2 = post(hs_ref[1])
    o1_ref[...] = h1
    o2_ref[...] = h2
    avg_ref[...] = (h1 + h2) * 0.5


def _cluster_kernel(havg_ref, h1_ref, h2_ref, mu0_ref, r_ref, r1_ref, r2_ref,
                    *, n_iter, temp):
    # TODO(synk): cluster() is undefined in model.py; this is ClusterNet-style
    # soft k-means.  mu is fitted once on the averaged embedding and reused for
    # r1/r2 (perf review); deterministic init replaces sklearn k-means++.
    def rownorm(x):
        nrm2 = jnp.sum(x * x, axis=1, keepdims=True)
        return x * lax.rsqrt(jnp.maximum(nrm2, CLUSTER_EPS * CLUSTER_EPS))

    data = rownorm(havg_ref[...])

    def resp(dat, mu_):
        dist = jnp.einsum('nd,kd->nk', dat, mu_, preferred_element_type=jnp.float32)
        logits = temp * dist
        ex = jnp.exp(logits - jnp.max(logits, axis=1, keepdims=True))
        return ex * pl.reciprocal(jnp.sum(ex, axis=1, keepdims=True), approx=True)

    def body(_, mu_):
        r = resp(data, mu_)
        cnt = jnp.sum(r, axis=0, keepdims=True)                    # (1, Kc)
        rs = r * pl.reciprocal(cnt + CLUSTER_EPS, approx=True)     # diag(1/cnt) folded in
        return jnp.einsum('nk,nd->kd', rs, data, preferred_element_type=jnp.float32)

    mu = lax.fori_loop(0, n_iter, body, mu0_ref[...])
    r_ref[...] = resp(data, mu)
    r1_ref[...] = resp(rownorm(h1_ref[...]), mu)
    r2_ref[...] = resp(rownorm(h2_ref[...]), mu)


# ------------------------------ pallas_call glue ------------------------------

def linear_blend_pair(x_stack, wa_stack, a_stack, ws_stack, b_stack, *, tm):
    _, n, in_dim = x_stack.shape
    d = wa_stack.shape[2]
    nnum = a_stack.shape[2]
    est = 4 * 2 * (tm * in_dim + in_dim * d + tm * nnum + nnum * d + d + tm * d)
    return pl.pallas_call(
        _blend_kernel,
        out_shape=jax.ShapeDtypeStruct((2, n, d), jnp.float32),
        grid=(2, pl.cdiv(n, tm)),
        in_specs=[pl.BlockSpec((None, tm, in_dim), lambda g, i: (g, i, 0)),
                  pl.BlockSpec((None, in_dim, d), lambda g, i: (g, 0, 0)),
                  pl.BlockSpec((None, tm, nnum), lambda g, i: (g, i, 0)),
                  pl.BlockSpec((None, nnum, d), lambda g, i: (g, 0, 0)),
                  pl.BlockSpec((None, 1, d), lambda g, i: (g, 0, 0))],
        out_specs=pl.BlockSpec((None, tm, d), lambda g, i: (g, i, 0)),
        compiler_params=_mosaic_params(est, ("parallel", "parallel")),
    )(x_stack, wa_stack, a_stack, ws_stack, b_stack)


def pca_forward_pair(x_stack, w_stack, b_stack, *, tm):
    _, n, in_dim = x_stack.shape
    d = w_stack.shape[2]
    est = 4 * 2 * (tm * in_dim + in_dim * d + d + tm * d)
    return pl.pallas_call(
        _pca_kernel,
        out_shape=jax.ShapeDtypeStruct((2, n, d), jnp.float32),
        grid=(2, pl.cdiv(n, tm)),
        in_specs=[pl.BlockSpec((None, tm, in_dim), lambda g, i: (g, i, 0)),
                  pl.BlockSpec((None, in_dim, d), lambda g, i: (g, 0, 0)),
                  pl.BlockSpec((None, 1, d), lambda g, i: (g, 0, 0))],
        out_specs=pl.BlockSpec((None, tm, d), lambda g, i: (g, i, 0)),
        compiler_params=_mosaic_params(est, ("parallel", "parallel")),
    )(x_stack, w_stack, b_stack)


def neib_rout_layer_pair(h_stack, src_flat, trg_flat, m_arr, c, ct,
                         *, n_iter, tau, te, m_pad):
    _, n, d = h_stack.shape
    k = c.shape[1]
    n_et = m_pad // te
    unroll = 8 if te % 8 == 0 else (4 if te % 4 == 0 else (2 if te % 2 == 0 else 1))
    kern = functools.partial(_rout_layer_kernel, te=te, tau=tau, m_pad=m_pad,
                             unroll=unroll)
    # double-buffered h/o blocks + 2 (n,d) scratch + 3 edge-tile buffers
    est = 4 * (4 * n * d + 2 * n * d + 3 * te * d + 4 * d * k)
    return pl.pallas_call(
        kern,
        out_shape=jax.ShapeDtypeStruct((2, n, d), jnp.float32),
        grid_spec=pltpu.PrefetchScalarGridSpec(
            num_scalar_prefetch=3,
            grid=(2, n_iter, n_et),
            in_specs=[pl.BlockSpec((None, n, d), lambda g, it, et, s, t, mc: (g, 0, 0)),
                      pl.BlockSpec((d, k), lambda g, it, et, s, t, mc: (0, 0)),
                      pl.BlockSpec((k, d), lambda g, it, et, s, t, mc: (0, 0))],
            out_specs=pl.BlockSpec((None, n, d), lambda g, it, et, s, t, mc: (g, 0, 0)),
            scratch_shapes=[
                pltpu.VMEM((n, d), jnp.float32),   # u_cur
                pltpu.VMEM((n, d), jnp.float32),   # u_acc
                pltpu.VMEM((te, d), jnp.float32),  # z gather tile
                pltpu.VMEM((te, d), jnp.float32),  # u[trg] gather tile
                pltpu.VMEM((te, d), jnp.float32),  # scatter-source tile
            ],
        ),
        compiler_params=_mosaic_params(est, ("parallel", "arbitrary", "arbitrary")),
    )(src_flat, trg_flat, m_arr, h_stack, c, ct)


def head_normalize(h_stack, c, ct, *, act, tm):
    _, n, d = h_stack.shape
    node = pl.BlockSpec((tm, d), lambda i: (i, 0))
    kern = functools.partial(_head_norm_kernel, act=act)
    est = 4 * 2 * (5 * tm * d + 2 * c.size)
    return pl.pallas_call(
        kern,
        out_shape=tuple(jax.ShapeDtypeStruct((n, d), jnp.float32) for _ in range(3)),
        grid=(pl.cdiv(n, tm),),
        in_specs=[pl.BlockSpec((2, tm, d), lambda i: (0, i, 0)),
                  pl.BlockSpec(c.shape, lambda i: (0, 0)),
                  pl.BlockSpec(ct.shape, lambda i: (0, 0))],
        out_specs=(node, node, node),
        compiler_params=_mosaic_params(est, ("parallel",)),
    )(h_stack, c, ct)


def soft_cluster(havg, h1, h2, mu0, *, n_iter, temp):
    n, d = havg.shape
    kc = mu0.shape[0]
    kern = functools.partial(_cluster_kernel, n_iter=n_iter, temp=temp)
    est = 4 * 2 * (3 * n * d + 3 * n * kc + kc * d)
    return pl.pallas_call(
        kern,
        out_shape=tuple(jax.ShapeDtypeStruct((n, kc), jnp.float32) for _ in range(3)),
        compiler_params=_mosaic_params(est),
    )(havg, h1, h2, mu0)


# --------------------------------- the module ---------------------------------

class DisenClusterPallas:
    def __init__(self, input_dim, hidden_dim, act, n_num, n_cluster, args, key,
                 node_tile=None, edge_tile=None):
        self.K = args.K
        self.n_iter = args.n_iter
        self.n_layer = args.n_layer
        self.n_cluster = n_cluster
        self.cluster_temp = float(args.clustertemp)
        self.dataset = args.dataset
        self.act = act
        self.hidden_dim = hidden_dim
        assert hidden_dim % self.K == 0
        assert self.n_iter >= 1
        self.delta_d = hidden_dim // self.K
        self.node_tile = node_tile
        self.edge_tile = edge_tile

        ks = jax.random.split(key, 8)

        def lin(k, fan_in, fan_out):           # nn.Linear default init
            bound = 1.0 / (fan_in ** 0.5)
            k1, k2 = jax.random.split(k)
            w = jax.random.uniform(k1, (fan_in, fan_out), jnp.float32, -bound, bound)
            b = jax.random.uniform(k2, (1, fan_out), jnp.float32, -bound, bound)
            return w, b

        def sparse_lin(k, fan_in, fan_out):    # SparseInputLinear: stdv = 1/sqrt(out)
            stdv = 1.0 / (fan_out ** 0.5)
            k1, k2 = jax.random.split(k)
            w = jax.random.uniform(k1, (fan_in, fan_out), jnp.float32, -stdv, stdv)
            b = jax.random.uniform(k2, (1, fan_out), jnp.float32, -stdv, stdv)
            return w, b

        ae1_w, ae1_b = lin(ks[0], input_dim, hidden_dim)
        ae2_w, ae2_b = lin(ks[1], input_dim, hidden_dim)
        se1_w, se1_b = lin(ks[2], n_num, hidden_dim)
        se2_w, se2_b = lin(ks[3], n_num, hidden_dim)

        alpha = 0.99999                        # matches the PyTorch constant
        # alpha / (1-alpha) folded into the blend weights/bias at init
        self.ae_w = alpha * jnp.stack([ae1_w, ae2_w])                  # (2, in, hid)
        self.se_w = (1.0 - alpha) * jnp.stack([se1_w, se2_w])          # (2, n_num, hid)
        self.blend_b = (alpha * jnp.stack([ae1_b, ae2_b])
                        + (1.0 - alpha) * jnp.stack([se1_b, se2_b]))   # (2, 1, hid)

        enc_in = input_dim if self.dataset in ('cora', 'amap') else hidden_dim
        p1w, p1b = sparse_lin(ks[4], enc_in, hidden_dim)
        p2w, p2b = sparse_lin(ks[5], enc_in, hidden_dim)
        self.pca_w = jnp.stack([p1w, p2w])                             # (2, enc_in, hid)
        self.pca_b = jnp.stack([p1b, p2b])                             # (2, 1, hid)

        # TODO(synk): deterministic init replaces sklearn k-means++ init of cluster().
        self.init_mu = jax.random.uniform(ks[6], (n_cluster, hidden_dim), jnp.float32)

        # capsule indicator (d, K) + transpose, replaces a dense (d, d) mask.
        caps_id = jnp.arange(hidden_dim) // self.delta_d
        self.caps_c = (caps_id[:, None] == jnp.arange(self.K)[None, :]).astype(jnp.float32)
        self.caps_ct = jnp.transpose(self.caps_c)

    def _tm(self, n):
        if self.node_tile is not None:
            return self.node_tile
        return n if n <= 512 else 512          # 512-row tiles ~85% of HBM roofline

    def _te(self, m):
        if self.edge_tile is not None:
            return self.edge_tile
        return min(1024, _round_up(max(m, 1), 8))   # big edge tiles amortize grid overhead

    def _encode_pair(self, x_stack, edges, tm):
        n = x_stack.shape[1]
        m0, m1 = int(edges[0].shape[1]), int(edges[1].shape[1])
        te = self._te(max(m0, m1))
        m_pad = _round_up(max(m0, m1), te)

        def prep(edge, m):
            src = edge[0].astype(jnp.int32)
            trg = edge[1].astype(jnp.int32)
            order = jnp.argsort(trg)           # sort by target -> coalesced scatter runs
            src = jnp.pad(src[order], (0, m_pad - m))
            trg = jnp.pad(trg[order], (0, m_pad - m), constant_values=n - 1)
            return src, trg

        s0, t0 = prep(edges[0], m0)
        s1, t1 = prep(edges[1], m1)
        src_flat = jnp.concatenate([s0, s1])
        trg_flat = jnp.concatenate([t0, t1])
        m_arr = jnp.array([m0, m1], jnp.int32)

        # TODO(synk): for very large edge counts keep src/trg in HBM (pl.ANY) and
        # DMA per-tile index slices instead of full SMEM scalar prefetch.
        h = pca_forward_pair(x_stack, self.pca_w, self.pca_b, tm=tm)
        for _ in range(self.n_layer):
            h = neib_rout_layer_pair(h, src_flat, trg_flat, m_arr,
                                     self.caps_c, self.caps_ct,
                                     n_iter=self.n_iter, tau=1.0,
                                     te=te, m_pad=m_pad)
        return h

    def __call__(self, x, x_1, A, A_1, A_edge, A_edge_1, n_cluster_iter):
        n = x.shape[0]
        tm = self._tm(n)

        x_stack = jnp.stack([x, x_1])          # (2, n, in)
        a_stack = jnp.stack([A, A_1])          # (2, n, n_num)
        # alpha*Z + (1-alpha)*E (computed unconditionally, as in the reference;
        # unused on the cora/amap branch).
        ze = linear_blend_pair(x_stack, self.ae_w, a_stack, self.se_w,
                               self.blend_b, tm=tm)

        if self.dataset in ('cora', 'amap'):
            h = self._encode_pair(x_stack, (A_edge, A_edge_1), tm)
        else:
            # PyTorch reference routes both encoders over A_edge in this branch.
            h = self._encode_pair(ze, (A_edge, A_edge), tm)

        h1n, h2n, havg = head_normalize(h, self.caps_c, self.caps_ct,
                                        act=self.act, tm=tm)
        r, r1, r2 = soft_cluster(havg, h1n, h2n, self.init_mu,
                                 n_iter=int(n_cluster_iter), temp=self.cluster_temp)
        return h1n, h2n, r, r1, r2


# ------------------------------------ main ------------------------------------

if __name__ == "__main__":
    key = jax.random.PRNGKey(0)
    n_nodes, input_dim, hidden_dim = 32, 12, 16
    n_num = n_nodes
    m_edges = 48
    n_cluster = 4

    args = SimpleNamespace(dataset='cora', K=4, n_iter=2, n_layer=2,
                           dropout=0.0, clustertemp=30.0, mu=0.5, device=None)

    ks = jax.random.split(key, 8)
    x = jax.random.normal(ks[0], (n_nodes, input_dim), jnp.float32)
    x_1 = jax.random.normal(ks[1], (n_nodes, input_dim), jnp.float32)
    A = (jax.random.uniform(ks[2], (n_nodes, n_num)) < 0.25).astype(jnp.float32)
    A_1 = (jax.random.uniform(ks[3], (n_nodes, n_num)) < 0.25).astype(jnp.float32)
    A_edge = jax.random.randint(ks[4], (2, m_edges), 0, n_nodes, dtype=jnp.int32)
    A_edge_1 = jax.random.randint(ks[5], (2, m_edges), 0, n_nodes, dtype=jnp.int32)

    model = DisenClusterPallas(input_dim, hidden_dim, 'sigmoid', n_num,
                               n_cluster, args, ks[6],
                               node_tile=16, edge_tile=16)
    outs = model(x, x_1, A, A_1, A_edge, A_edge_1, n_cluster_iter=3)
    jax.block_until_ready(outs)
    print("KERNEL_OK")
</pallas_src>

<mosaic_0001>
module attributes {stable_mosaic.version = 11 : i64} {
  func.func @_blend_kernel(%arg0: i32, %arg1: i32, %arg2: memref<1x16x12xf32, #tpu.memory_space<vmem>>, %arg3: memref<1x12x16xf32, #tpu.memory_space<vmem>>, %arg4: memref<1x16x32xf32, #tpu.memory_space<vmem>>, %arg5: memref<1x32x16xf32, #tpu.memory_space<vmem>>, %arg6: memref<1x1x16xf32, #tpu.memory_space<vmem>>, %arg7: memref<1x16x16xf32, #tpu.memory_space<vmem>>) attributes {dimension_semantics = [#tpu.dimension_semantics<parallel>, #tpu.dimension_semantics<parallel>], iteration_bounds = array<i64: 2, 2>, scalar_prefetch = 0 : i64, scratch_operands = 0 : i64, tpu.core_type = #tpu.core_type<tc>, window_params = [{transform_indices = @transform_0, window_bounds = array<i64: 1, 16, 12>}, {transform_indices = @transform_1, window_bounds = array<i64: 1, 12, 16>}, {transform_indices = @transform_2, window_bounds = array<i64: 1, 16, 32>}, {transform_indices = @transform_3, window_bounds = array<i64: 1, 32, 16>}, {transform_indices = @transform_4, window_bounds = array<i64: 1, 1, 16>}, {transform_indices = @transform_5, window_bounds = array<i64: 1, 16, 16>}]} {
    %c0 = arith.constant 0 : index
    %c0_0 = arith.constant 0 : index
    %c0_1 = arith.constant 0 : index
    %0 = vector.load %arg2[%c0, %c0_0, %c0_1] : memref<1x16x12xf32, #tpu.memory_space<vmem>>, vector<1x16x12xf32>
    %1 = vector.shape_cast %0 : vector<1x16x12xf32> to vector<16x12xf32>
    %c0_2 = arith.constant 0 : index
    %c0_3 = arith.constant 0 : index
    %c0_4 = arith.constant 0 : index
    %2 = vector.load %arg3[%c0_2, %c0_3, %c0_4] : memref<1x12x16xf32, #tpu.memory_space<vmem>>, vector<1x12x16xf32>
    %3 = vector.shape_cast %2 : vector<1x12x16xf32> to vector<12x16xf32>
    %cst = arith.constant dense<0.000000e+00> : vector<16x16xf32>
    %4 = tpu.matmul %1, %3, %cst {dimension_numbers = #tpu.dot_dimension_numbers<[1], [0], [0], [1], [0, 0, 1, 1], [], []>} : vector<16x12xf32>, vector<12x16xf32>, vector<16x16xf32> -> vector<16x16xf32>
    %c0_5 = arith.constant 0 : index
    %c0_6 = arith.constant 0 : index
    %c0_7 = arith.constant 0 : index
    %5 = vector.load %arg4[%c0_5, %c0_6, %c0_7] : memref<1x16x32xf32, #tpu.memory_space<vmem>>, vector<1x16x32xf32>
    %6 = vector.shape_cast %5 : vector<1x16x32xf32> to vector<16x32xf32>
    %c0_8 = arith.constant 0 : index
    %c0_9 = arith.constant 0 : index
    %c0_10 = arith.constant 0 : index
    %7 = vector.load %arg5[%c0_8, %c0_9, %c0_10] : memref<1x32x16xf32, #tpu.memory_space<vmem>>, vector<1x32x16xf32>
    %8 = vector.shape_cast %7 : vector<1x32x16xf32> to vector<32x16xf32>
    %cst_11 = arith.constant dense<0.000000e+00> : vector<16x16xf32>
    %9 = tpu.matmul %6, %8, %cst_11 {dimension_numbers = #tpu.dot_dimension_numbers<[1], [0], [0], [1], [0, 0, 1, 1], [], []>} : vector<16x32xf32>, vector<32x16xf32>, vector<16x16xf32> -> vector<16x16xf32>
    %10 = arith.addf %4, %9 : vector<16x16xf32>
    %c0_12 = arith.constant 0 : index
    %c0_13 = arith.constant 0 : index
    %c0_14 = arith.constant 0 : index
    %11 = vector.load %arg6[%c0_12, %c0_13, %c0_14] : memref<1x1x16xf32, #tpu.memory_space<vmem>>, vector<1x1x16xf32>
    %12 = vector.shape_cast %11 : vector<1x1x16xf32> to vector<1x16xf32>
    %13 = vector.broadcast %12 : vector<1x16xf32> to vector<16x16xf32>
    %14 = arith.addf %10, %13 : vector<16x16xf32>
    %c0_15 = arith.constant 0 : index
    %c0_16 = arith.constant 0 : index
    %c0_17 = arith.constant 0 : index
    %15 = vector.load %arg7[%c0_15, %c0_16, %c0_17] : memref<1x16x16xf32, #tpu.memory_space<vmem>>, vector<1x16x16xf32>
    %16 = vector.shape_cast %15 : vector<1x16x16xf32> to vector<16x16xf32>
    %17 = vector.shape_cast %14 : vector<16x16xf32> to vector<1x16x16xf32>
    tpu.vector_store %arg7[%c0_15, %c0_16, %c0_17], %17 {strides = array<i32>} : memref<1x16x16xf32, #tpu.memory_space<vmem>>, vector<1x16x16xf32>,
    return
  }
  func.func @transform_0(%arg0: i32, %arg1: i32) -> (i32, i32, i32) {
    %c0_i32 = arith.constant 0 : i32
    %c0_i32_0 = arith.constant 0 : i32
    return %arg0, %arg1, %c0_i32 : i32, i32, i32
  }
  func.func @transform_1(%arg0: i32, %arg1: i32) -> (i32, i32, i32) {
    %c0_i32 = arith.constant 0 : i32
    %c0_i32_0 = arith.constant 0 : i32
    %c0_i32_1 = arith.constant 0 : i32
    return %arg0, %c0_i32, %c0_i32_0 : i32, i32, i32
  }
  func.func @transform_2(%arg0: i32, %arg1: i32) -> (i32, i32, i32) {
    %c0_i32 = arith.constant 0 : i32
    %c0_i32_0 = arith.constant 0 : i32
    return %arg0, %arg1, %c0_i32 : i32, i32, i32
  }
  func.func @transform_3(%arg0: i32, %arg1: i32) -> (i32, i32, i32) {
    %c0_i32 = arith.constant 0 : i32
    %c0_i32_0 = arith.constant 0 : i32
    %c0_i32_1 = arith.constant 0 : i32
    return %arg0, %c0_i32, %c0_i32_0 : i32, i32, i32
  }
  func.func @transform_4(%arg0: i32, %arg1: i32) -> (i32, i32, i32) {
    %c0_i32 = arith.constant 0 : i32
    %c0_i32_0 = arith.constant 0 : i32
    %c0_i32_1 = arith.constant 0 : i32
    return %arg0, %c0_i32, %c0_i32_0 : i32, i32, i32
  }
  func.func @transform_5(%arg0: i32, %arg1: i32) -> (i32, i32, i32) {
    %c0_i32 = arith.constant 0 : i32
    %c0_i32_0 = arith.constant 0 : i32
    return %arg0, %arg1, %c0_i32 : i32, i32, i32
  }
}

</mosaic_0001>

<bundles_post_ra>
// kernel: tpu_custom_call.1
= control target key start
LH: loop header
LB: loop body
LE: loop exit
PB: predicated region body
PF: predicated region fallthrough
CT: control target
= control target key end

     0   :  { %s869_s18 = smov 0   ;;  %s871_s19 = smov 0   ;;  %s946_s0 = inlined_call_operand.vmem [shape: f32[2,32,12], index: 0, kind: input, shape index: {}]   ;;  %s947_s1 = inlined_call_operand.vmem [shape: f32[2,12,16], index: 1, kind: input, shape index: {}]   ;;  %s948_s2 = inlined_call_operand.vmem [shape: f32[2,32,32], index: 2, kind: input, shape index: {}]   ;;  %s949_s3 = inlined_call_operand.vmem [shape: f32[2,32,16], index: 3, kind: input, shape index: {}]   ;;  %s950_s4 = inlined_call_operand.vmem [shape: f32[2,1,16], index: 4, kind: input, shape index: {}]   ;;  %s951_s5 = inlined_call_operand.vmem [shape: f32[2,32,16], index: 5, kind: output, shape index: {}]  }
   0x1   :  { %s873_s20 = smov 0   ;;  %s875_s21 = smov 0  }
   0x2   :  { %s877_s22 = smov 0  }
   0x3 LB: > { %s24_s23 = sadd.s32 1, %s828_s20  ;;  %s27_s24 = sadd.s32 1, %s832_s21  ;;  %s836_s22 = sphi %s877_s22, %s15_s22   ;;  %s832_s21 = sphi %s875_s21, %s957_s21   ;;  %s828_s20 = sphi %s873_s20, %s956_s20   ;;  %s824_s19 = sphi %s871_s19, %s955_s19   ;;  %s820_s18 = sphi %s869_s18, %s954_s18  }
   0x4   : > { %p25_p0 = scmp.ge.s32.totalorder %s24_s23, 2  ;;  %p689_p1 = scmp.ge.s32.totalorder %s836_s22, 1 }
   0x5   : > { %p253_p2 = scmp.lt.s32.totalorder %s836_s22, 5 }
   0x6   : > { %s959_s23 = smov (%p25_p0, %s24_s23), 0  ;;  %s961_s24 = smov (!%p25_p0, %s27_s24), %s832_s21 }
   0x7   : > { %p254_p3 = pnand %p689_p1, %p253_p2  ;;  %p29_p4 = scmp.ge.s32.totalorder %s961_s24, 2 }
   0x8   : > { %p312_p5 = scmp.lt.s32.totalorder (!%p254_p3), %s824_s19, 1  ;;  %s690_s25 = sshll.u32 (!%p254_p3), %s820_s18, 1  ;;  %vm453_vm0 = vcmask (!%p254_p3), 1043456   ;;  %vm838_vm1 = vmmov (!%p254_p3), 1   ;;  %vm446_vm3 = vcmask (!%p254_p3), 97280   ;;  %vm364_vm4 = vcmask (!%p254_p3), 261120  }
   0x9   : > { %s963_s24 = smov (%p29_p4, %s961_s24), 0  ;;  %257 = sbr.rel (%p254_p3) target bundleno = 248 (0xf8), region = 40 }
   0xa   : > { %p314_p6 = scmp.lt.s32.totalorder (!%p254_p3), %s690_s25, 3  ;;  %vm909_vm2 = vmpackc.low (!%p254_p3), %vm453_vm0, %vm838_vm1  ;;  %vm541_vm5 = vcmask (!%p254_p3), 130048  }
  0x10   : > { %s965_s19 = smov (!%p312_p5, %s824_s19), 1  ;;  %s967_s25 = smov (!%p314_p6, %s690_s25), 3 }
  0x11   : > { %s712_s26 = sshll.u32 %s965_s19, 5  ;;  %s711_s27 = sshll.u32 %s965_s19, 4 }
  0x12   : > { %s340_s30 = scalar_lea.vmem %s949_s3, %s712_s26  ;;  %s325_s8 = scalar_lea.vmem %s947_s1, %s711_s27 }
  0x13   : > { %v360_v1 = vld [vmem:[%s340_s30] sm:$0xff]  ;;  %v361_v2 = vld [vmem:[%s340_s30 + $0x8] sm:$0xff]  ;;  %s691_s9 = sshll.u32 %s965_s19, 2  ;;  %v362_v6 = vld [vmem:[%s340_s30 + $0x10] sm:$0xff]  ;;  %s343_s26 = scalar_lea.vmem %s950_s4, %s965_s19 }
  0x14   : > { %v356_v3 = vld [vmem:[%s325_s8] sm:$0xff]  ;;  %v741_v4 = vpack.c.bf16 %v361_v2, %v360_v1  ;;  %v357_v5 = vld [vmem:[%s325_s8 + $0x8] sm:$0xf]  ;;  %v363_v7 = vld [vmem:[%s340_s30 + $0x18] sm:$0xff]  ;;  %s317_s10 = sadd.s32 %s691_s9, %s967_s25 }
  0x15   : > { %v749_v8 = vpack.c.bf16 %v357_v5, %v356_v3  ;;  %v745_v9 = vpack.c.bf16 %v363_v7, %v362_v6  ;;  %s692_s11 = sshll.u32 %s317_s10, 3  ;;  %v708_v17 = vld [vmem:[%s343_s26] ss:$0 sm:$0xff] }
  0x16   : > { %742 = vmatprep.subr.bf16.mxu1 %v741_v4  ;;  %s319_s14 = scalar_lea.vmem %s946_s0, %s692_s11  ;;  %s334_s17 = scalar_lea.vmem %s948_s2, %s692_s11 }
  0x17   : > { %744 = vmatpush3.bf16.msra.mxu1 %v741_v4  ;;  %751 = vmatprep.subr.msk.bf16.mxu0 %vm909_vm2, %v749_v8  ;;  %v354_v10 = vld [vmem:[%s319_s14] sm:$0xff]  ;;  %v355_v11 = vld [vmem:[%s319_s14 + $0x8] sm:$0xff]  ;;  %s352_s29 = scalar_lea.vmem %s951_s5, %s692_s11 }
  0x18   : > { %746 = vmatprep.subr.bf16.mxu1 %v745_v9  ;;  %754 = vmatpush3.bf16.msk.msra.mxu0 %vm909_vm2, %v749_v8  ;;  %v358_v12 = vld [vmem:[%s334_s17] sm:$0xff]  ;;  %v359_v13 = vld [vmem:[%s334_s17 + $0x8] sm:$0xff] }
  0x19   : > { %738 = vmatprep.mubr.msk.f32.mxu0 %vm446_vm3, %v354_v10  ;;  %731 = vmatprep.mubr.msk.f32.mxu1 %vm364_vm4, %v358_v12 }
  0x1b   : > { %748 = vmatpush3.bf16.msra.mxu1 %v745_v9  ;;  %739 = vmatmul.mubr.msk.f32.vlgmr.msra.gmra.mrb[0].mxu0 %vm446_vm3, %v355_v11 }
  0x1e   : > { %732 = vmatmul.mubr.msk.f32.vlgmr.msra.gmra.mrb[0].mxu1 %vm364_vm4, %v359_v13 }
  0xee   : > { %v740_v14 = vpop.f32.mrb[0].mxu0 }
  0xef   : > { %v523_v15 = vpop.f32.mrb[1].mxu0 }
  0xf1   : > { %v733_v16 = vpop.f32.mrb[0].mxu1 }
  0xf2   : > { %v529_v18 = vadd.f32 %v740_v14, %v733_v16  ;;  %v437_v19 = vpop.f32.mrb[1].mxu1 }
  0xf3   : > { %v524_v20 = vadd.f32 %v523_v15, %v437_v19 }
  0xf4   : > { %v540_v21 = vadd.f32 %v708_v17, %v529_v18 }
  0xf5   : > { %v539_v22 = vadd.f32 %v708_v17, %v524_v20 }
  0xf6   : > { %543 = vst.msk [vmem:[%s352_s29 + $0x8] sm:$0xff] %vm541_vm5, %v540_v21 }
  0xf7   : > { %542 = vst.msk [vmem:[%s352_s29] sm:$0xff] %vm541_vm5, %v539_v22 }
  0xf8 PF: > { %s15_s22 = sadd.s32 1, %s836_s22   ;;  %s954_s18 = smov %s828_s20 }
  0xf9   : > { %p12_p7 = scmp.ge.s32.totalorder %s15_s22, 6   ;;  %s955_s19 = smov %s832_s21 }
  0xfa   : > { %s956_s20 = smov %s959_s23  ;;  %s957_s21 = smov %s963_s24 }
  0xfb   :  { %14 = sbr.rel (!%p12_p7) target bundleno = 3 (0x3), region = 82 }

</bundles_post_ra>
